<compile_context>
chip_gen: v7x
topology: tpu7x:2x2x1
jax: 0.10.0
libtpu: 0.0.40
codegen_flags: <defaults>
</compile_context>

<pallas_src>
import functools

import jax
import jax.numpy as jnp
from jax.experimental import pallas as pl
from jax.experimental.pallas import tpu as pltpu

HIDDEN_IN = 768     # AST pooler_output dim
HIDDEN_MID = 100    # linear1 out
NUM_CLASSES = 10    # linear2 out
PAD_MID = 128       # lane-padded hidden
PAD_OUT = 128       # lane-padded output


def _head_kernel(x_ref, w1_ref, b1_ref, w2_ref, b2_ref, o_ref):
    # x arrives bf16. relu commutes with bf16 rounding, so relu-in-bf16 here
    # matches relu(f32)->bf16 exactly; Mosaic upcasts internally on v5e
    # (no bf16 VALU) and the extra convert is free filler under the DMA
    # bottleneck.
    x = jnp.maximum(x_ref[...], 0)
    # linear1: [TB,768] @ [768,128] bf16 MXU inputs, f32 accumulate.
    # Padded cols >= 100 have all-zero weights/bias.
    h = jnp.dot(x, w1_ref[...], preferred_element_type=jnp.float32) + b1_ref[...]
    # relu2 in f32 (padded cols stay exactly 0), cast to bf16 for second matmul.
    h = jnp.maximum(h, 0.0).astype(jnp.bfloat16)
    # linear2: [TB,128] @ [128,128]; padded output cols >= 10 are all-zero.
    o = jnp.dot(h, w2_ref[...], preferred_element_type=jnp.float32) + b2_ref[...]
    o_ref[...] = o.astype(o_ref.dtype)


def prepare_head_params(w1, b1, w2, b2):
    """Pad + cast the classifier head parameters ONCE (cache the result).

    w1: [768, 100], b1: [100], w2: [100, 10], b2: [10]  (all f32).
    Returns lane-padded (bf16 weights, f32 biases) ready for the kernel.
    """
    w1p = (jnp.zeros((HIDDEN_IN, PAD_MID), jnp.bfloat16)
           .at[:, :HIDDEN_MID].set(w1.astype(jnp.bfloat16)))
    b1p = jnp.zeros((1, PAD_MID), jnp.float32).at[0, :HIDDEN_MID].set(b1)
    w2p = (jnp.zeros((PAD_MID, PAD_OUT), jnp.bfloat16)
           .at[:HIDDEN_MID, :NUM_CLASSES].set(w2.astype(jnp.bfloat16)))
    b2p = jnp.zeros((1, PAD_OUT), jnp.float32).at[0, :NUM_CLASSES].set(b2)
    return w1p, b1p, w2p, b2p


def _round_up(a, m):
    return ((a + m - 1) // m) * m


@functools.partial(jax.jit, static_argnames=("tb", "out_dtype"))
def ast_classifier_head(x, w1p, b1p, w2p, b2p, *, tb=512,
                        out_dtype=jnp.bfloat16):
    """x: [B, 768] (AST pooler_output, f32 or bf16). Returns [B, 10] out_dtype.

    w1p/b1p/w2p/b2p must come from prepare_head_params() (padded once).
    Ideally the (frozen) backbone emits bf16 pooler_output so the cast below
    fuses away / is a no-op; it is the dominant HBM tensor of this head.
    """
    B = x.shape[0]
    assert x.shape[1] == HIDDEN_IN

    if x.dtype != jnp.bfloat16:
        x = x.astype(jnp.bfloat16)

    B8 = _round_up(B, 8)                      # minimum sublane granularity

    # Number of batch tiles:
    #   * at most ceil(B8 / tb) rows per tile (tb=512 default: big tiles
    #     amortize the ~0.35 us per-grid-step overhead and sit near the HBM
    #     roofline; 512*768 bf16 x-tile is only 0.75 MiB -> well inside every
    #     generation's VMEM, including v7x's 32 MiB scoped default),
    #   * at least 2 tiles whenever B8 > 8 so v7x's two TensorCores both get
    #     work under dimension_semantics=("parallel",).
    n_tiles = pl.cdiv(B8, tb)
    if B8 > 8:
        n_tiles = max(n_tiles, 2)
    # Smallest multiple-of-8 tile that covers B8 in n_tiles tiles. For common
    # batch sizes this divides exactly and no wrapper-side jnp.pad (an extra
    # full HBM round trip of x) is ever issued.
    TB = _round_up(pl.cdiv(B8, n_tiles), 8)
    Bp = n_tiles * TB
    if Bp != B:
        x = jnp.pad(x, ((0, Bp - B), (0, 0)))

    out_itemsize = jnp.dtype(out_dtype).itemsize
    flops = 2 * Bp * HIDDEN_IN * PAD_MID + 2 * Bp * PAD_MID * PAD_OUT
    bytes_accessed = (
        Bp * HIDDEN_IN * 2                  # x (bf16)
        + HIDDEN_IN * PAD_MID * 2           # w1 (bf16)
        + PAD_MID * 4                       # b1 (f32)
        + PAD_MID * PAD_OUT * 2             # w2 (bf16)
        + PAD_OUT * 4                       # b2 (f32)
        + Bp * PAD_OUT * out_itemsize       # out
    )

    out_padded = pl.pallas_call(
        _head_kernel,
        out_shape=jax.ShapeDtypeStruct((Bp, PAD_OUT), out_dtype),
        grid=(n_tiles,),
        in_specs=[
            pl.BlockSpec((TB, HIDDEN_IN), lambda i: (i, 0)),       # x tiled
            pl.BlockSpec((HIDDEN_IN, PAD_MID), lambda i: (0, 0)),  # w1 resident
            pl.BlockSpec((1, PAD_MID), lambda i: (0, 0)),          # b1 resident
            pl.BlockSpec((PAD_MID, PAD_OUT), lambda i: (0, 0)),    # w2 resident
            pl.BlockSpec((1, PAD_OUT), lambda i: (0, 0)),          # b2 resident
        ],
        out_specs=pl.BlockSpec((TB, PAD_OUT), lambda i: (i, 0)),
        compiler_params=pltpu.CompilerParams(
            dimension_semantics=("parallel",)),
        cost_estimate=pl.CostEstimate(
            flops=flops, transcendentals=0, bytes_accessed=bytes_accessed),
    )(x, w1p, b1p, w2p, b2p)

    # Slice off batch/class padding. Large-B consumers can instead take the
    # padded (Bp, 128) slab directly and slice lazily to skip this copy.
    return out_padded[:B, :NUM_CLASSES]


def _init_linear(key, fan_in, fan_out):
    # Mimic torch.nn.Linear default init: U(-1/sqrt(fan_in), 1/sqrt(fan_in))
    kw, kb = jax.random.split(key)
    bound = 1.0 / jnp.sqrt(jnp.float32(fan_in))
    w = jax.random.uniform(kw, (fan_in, fan_out), jnp.float32, -bound, bound)
    b = jax.random.uniform(kb, (fan_out,), jnp.float32, -bound, bound)
    return w, b


def reference_head_f32(x, w1, b1, w2, b2):
    x = jnp.maximum(x, 0.0)
    x = x @ w1 + b1
    x = jnp.maximum(x, 0.0)
    x = x @ w2 + b2
    return x


def reference_head_bf16(x, w1, b1, w2, b2):
    # Matches the kernel's numerics: bf16 MXU inputs, f32 accumulation.
    xb = jnp.maximum(x, 0.0).astype(jnp.bfloat16)
    h = jnp.dot(xb, w1.astype(jnp.bfloat16),
                preferred_element_type=jnp.float32) + b1
    hb = jnp.maximum(h, 0.0).astype(jnp.bfloat16)
    return jnp.dot(hb, w2.astype(jnp.bfloat16),
                   preferred_element_type=jnp.float32) + b2


if __name__ == "__main__":
    key = jax.random.PRNGKey(0)
    k_x, k_l1, k_l2 = jax.random.split(key, 3)

    B = 8  # batch of audio samples
    # Synthetic stand-in for the frozen AST backbone pooler_output: [B, 768]
    x_pooler = jax.random.normal(k_x, (B, HIDDEN_IN), jnp.float32)

    w1, b1 = _init_linear(k_l1, HIDDEN_IN, HIDDEN_MID)
    w2, b2 = _init_linear(k_l2, HIDDEN_MID, NUM_CLASSES)

    # Pad + cast parameters ONCE (not per forward call).
    w1p, b1p, w2p, b2p = prepare_head_params(w1, b1, w2, b2)
    w1p, b1p, w2p, b2p = jax.block_until_ready((w1p, b1p, w2p, b2p))

    out = ast_classifier_head(x_pooler, w1p, b1p, w2p, b2p)
    out = jax.block_until_ready(out)
    assert out.shape == (B, NUM_CLASSES)

    out_f32 = out.astype(jnp.float32)

    # Tight check vs a bf16-matched reference (same MXU numerics; only the
    # final bf16 store rounding differs).
    ref_bf16 = reference_head_bf16(x_pooler, w1, b1, w2, b2)
    assert jnp.allclose(out_f32, ref_bf16, atol=2e-2, rtol=2e-2), \
        "mismatch vs bf16-matched reference"

    # Loose sanity check vs the full-f32 module reference.
    ref_f32 = reference_head_f32(x_pooler, w1, b1, w2, b2)
    assert jnp.allclose(out_f32, ref_f32, atol=5e-2, rtol=5e-2), \
        "mismatch vs f32 reference"

    print("KERNEL_OK")
</pallas_src>

<mosaic_0001>
module attributes {stable_mosaic.version = 11 : i64} {
  func.func @_head_kernel(%arg0: i32, %arg1: memref<8x768xbf16, #tpu.memory_space<vmem>>, %arg2: memref<768x128xbf16, #tpu.memory_space<vmem>>, %arg3: memref<1x128xf32, #tpu.memory_space<vmem>>, %arg4: memref<128x128xbf16, #tpu.memory_space<vmem>>, %arg5: memref<1x128xf32, #tpu.memory_space<vmem>>, %arg6: memref<8x128xbf16, #tpu.memory_space<vmem>>) attributes {dimension_semantics = [#tpu.dimension_semantics<parallel>], iteration_bounds = array<i64: 1>, scalar_prefetch = 0 : i64, scratch_operands = 0 : i64, tpu.core_type = #tpu.core_type<tc>, window_params = [{transform_indices = @transform_0, window_bounds = array<i64: 8, 768>}, {pipeline_mode = #tpu.pipeline_mode<synchronous>, transform_indices = @transform_1, window_bounds = array<i64: 768, 128>}, {pipeline_mode = #tpu.pipeline_mode<synchronous>, transform_indices = @transform_2, window_bounds = array<i64: 1, 128>}, {pipeline_mode = #tpu.pipeline_mode<synchronous>, transform_indices = @transform_3, window_bounds = array<i64: 128, 128>}, {pipeline_mode = #tpu.pipeline_mode<synchronous>, transform_indices = @transform_4, window_bounds = array<i64: 1, 128>}, {transform_indices = @transform_5, window_bounds = array<i64: 8, 128>}]} {
    %c0 = arith.constant 0 : index
    %c0_0 = arith.constant 0 : index
    %0 = vector.load %arg1[%c0, %c0_0] : memref<8x768xbf16, #tpu.memory_space<vmem>>, vector<8x768xbf16>
    %cst = arith.constant 0.000000e+00 : bf16
    %1 = vector.broadcast %cst : bf16 to vector<8x768xbf16>
    %2 = arith.maximumf %0, %1 : vector<8x768xbf16>
    %c0_1 = arith.constant 0 : index
    %c0_2 = arith.constant 0 : index
    %3 = vector.load %arg2[%c0_1, %c0_2] : memref<768x128xbf16, #tpu.memory_space<vmem>>, vector<768x128xbf16>
    %cst_3 = arith.constant dense<0.000000e+00> : vector<8x128xf32>
    %4 = tpu.matmul %2, %3, %cst_3 {dimension_numbers = #tpu.dot_dimension_numbers<[1], [0], [0], [1], [0, 0, 1, 1], [], []>} : vector<8x768xbf16>, vector<768x128xbf16>, vector<8x128xf32> -> vector<8x128xf32>
    %c0_4 = arith.constant 0 : index
    %c0_5 = arith.constant 0 : index
    %5 = vector.load %arg3[%c0_4, %c0_5] : memref<1x128xf32, #tpu.memory_space<vmem>>, vector<1x128xf32>
    %6 = vector.broadcast %5 : vector<1x128xf32> to vector<8x128xf32>
    %7 = arith.addf %4, %6 : vector<8x128xf32>
    %cst_6 = arith.constant 0.000000e+00 : f32
    %8 = vector.broadcast %cst_6 : f32 to vector<8x128xf32>
    %9 = arith.maximumf %7, %8 : vector<8x128xf32>
    %10 = arith.truncf %9 : vector<8x128xf32> to vector<8x128xbf16>
    %c0_7 = arith.constant 0 : index
    %c0_8 = arith.constant 0 : index
    %11 = vector.load %arg4[%c0_7, %c0_8] : memref<128x128xbf16, #tpu.memory_space<vmem>>, vector<128x128xbf16>
    %cst_9 = arith.constant dense<0.000000e+00> : vector<8x128xf32>
    %12 = tpu.matmul %10, %11, %cst_9 {dimension_numbers = #tpu.dot_dimension_numbers<[1], [0], [0], [1], [0, 0, 1, 1], [], []>} : vector<8x128xbf16>, vector<128x128xbf16>, vector<8x128xf32> -> vector<8x128xf32>
    %c0_10 = arith.constant 0 : index
    %c0_11 = arith.constant 0 : index
    %13 = vector.load %arg5[%c0_10, %c0_11] : memref<1x128xf32, #tpu.memory_space<vmem>>, vector<1x128xf32>
    %14 = vector.broadcast %13 : vector<1x128xf32> to vector<8x128xf32>
    %15 = arith.addf %12, %14 : vector<8x128xf32>
    %16 = arith.truncf %15 : vector<8x128xf32> to vector<8x128xbf16>
    %c0_12 = arith.constant 0 : index
    %c0_13 = arith.constant 0 : index
    %17 = vector.load %arg6[%c0_12, %c0_13] : memref<8x128xbf16, #tpu.memory_space<vmem>>, vector<8x128xbf16>
    tpu.vector_store %arg6[%c0_12, %c0_13], %16 {strides = array<i32>} : memref<8x128xbf16, #tpu.memory_space<vmem>>, vector<8x128xbf16>,
    return
  }
  func.func @transform_0(%arg0: i32) -> (i32, i32) {
    %c0_i32 = arith.constant 0 : i32
    %c0_i32_0 = arith.constant 0 : i32
    return %arg0, %c0_i32 : i32, i32
  }
  func.func @transform_1(%arg0: i32) -> (i32, i32) {
    %c0_i32 = arith.constant 0 : i32
    %c0_i32_0 = arith.constant 0 : i32
    %c0_i32_1 = arith.constant 0 : i32
    return %c0_i32, %c0_i32_0 : i32, i32
  }
  func.func @transform_2(%arg0: i32) -> (i32, i32) {
    %c0_i32 = arith.constant 0 : i32
    %c0_i32_0 = arith.constant 0 : i32
    %c0_i32_1 = arith.constant 0 : i32
    return %c0_i32, %c0_i32_0 : i32, i32
  }
  func.func @transform_3(%arg0: i32) -> (i32, i32) {
    %c0_i32 = arith.constant 0 : i32
    %c0_i32_0 = arith.constant 0 : i32
    %c0_i32_1 = arith.constant 0 : i32
    return %c0_i32, %c0_i32_0 : i32, i32
  }
  func.func @transform_4(%arg0: i32) -> (i32, i32) {
    %c0_i32 = arith.constant 0 : i32
    %c0_i32_0 = arith.constant 0 : i32
    %c0_i32_1 = arith.constant 0 : i32
    return %c0_i32, %c0_i32_0 : i32, i32
  }
  func.func @transform_5(%arg0: i32) -> (i32, i32) {
    %c0_i32 = arith.constant 0 : i32
    %c0_i32_0 = arith.constant 0 : i32
    return %arg0, %c0_i32 : i32, i32
  }
}

</mosaic_0001>

<bundles_post_ra>
// kernel: ast_classifier_head.1
= control target key start
LH: loop header
LB: loop body
LE: loop exit
PB: predicated region body
PF: predicated region fallthrough
CT: control target
= control target key end

     0   :  { %10 = vsyncpa [#allocation3], 0  ;;  %s1074_s0 = inlined_call_operand.vmem [shape: bf16[8,768], index: 0, kind: input, shape index: {}]   ;;  %s1075_s1 = inlined_call_operand.hbm [shape: bf16[768,128], index: 1, kind: input, shape index: {}]   ;;  %s1076_s2 = inlined_call_operand.vmem [shape: f32[1,128], index: 2, kind: input, shape index: {}]   ;;  %s1077_s3 = inlined_call_operand.vmem [shape: bf16[128,128], index: 3, kind: input, shape index: {}]   ;;  %s1078_s4 = inlined_call_operand.vmem [shape: f32[1,128], index: 4, kind: input, shape index: {}]   ;;  %s1079_s5 = inlined_call_operand.hbm [shape: bf16[8,128], index: 5, kind: output, shape index: {}]  }
   0x1   :  { %11 = vsyncpa [#allocation4], 0  ;;  %s974_s18 = smov [#allocation2]   ;;  %s926_s22 = scalar_lea.hbm %s1075_s1, 6144 }
   0x2   :  { %s19_s19 = sshll.u32 %s974_s18, 4  ;;  %p927_p0 = scmp.ne.s32.totalorder %s1075_s1, %s926_s22  ;;  %s20_s19 = int_to_ptr.vmem [resolvable:$true] %s19_s19 }
   0x3   :  { %p930_p1 = scmp.lt.u32.totalorder %s926_s22, %s1075_s1 }
   0x5   :  { %p932_p2 = pnand %p930_p1, %p927_p0 }
   0x7   :  { %935 = shalt.err (!%p932_p2)
}
   0x8   :  { %s936_s27 = scalar_lea.vmem %s20_s19, 6144  ;;  %p941_p4 = scmp.lt.s32.totalorder %s20_s19, %s20_s19 }
   0x9   :  { %p937_p3 = scmp.ne.s32.totalorder %s20_s19, %s936_s27  ;;  %p942_p5 = scmp.lt.s32.totalorder %s936_s27, %s936_s27 }
   0xb   :  { %p943_p6 = por %p942_p5, %p941_p4 }
   0xd   :  { %p944_p7 = pnand %p943_p6, %p937_p3 }
   0xf   :  { %947 = shalt.err (!%p944_p7)
}
  0x10   :  { %s975_s28 = smov 64   ;;  %s976_s29 = smov 4  }
  0x11   :  { %25 = dma.hbm_to_vmem [thread:$0]  %s1075_s1, 6144, %s20_s19, [#allocation3], %s975_s28, %s975_s28, %s976_s29  }
  0x12   :  { %970 = dma.done.wait [#allocation3], 6144  }
  0x13   :  { %971 = vsyncadd [#allocation3], 4294961152  ;;  %v870_v0 = vld [vmem:[#allocation2 + $0x40] sm:$0xff]   ;;  %v874_v4 = vld [vmem:[#allocation2 + $0x48] sm:$0xff]   ;;  %v977_v32 = vmov 0   ;;  %v978_v62 = vmov 0.0  }
  0x14   :  { %v871_v1 = vld [vmem:[#allocation2] sm:$0xff]   ;;  %768 = vmatprep.subr.bf16.mxu0 %v870_v0  ;;  %v875_v5 = vld [vmem:[#allocation2 + $0x8] sm:$0xff]   ;;  %v878_v8 = vld [vmem:[#allocation2 + $0x50] sm:$0xff]   ;;  %vm979_vm0 = vmmov 0   ;;  %s980_s29 = smov [#allocation5]  }
  0x15   :  { %v872_v2 = vld [vmem:[#allocation2 + $0xc0] sm:$0xff]   ;;  %769 = vmatpush3.bf16.msra.mxu0 %v871_v1  ;;  %v876_v6 = vld [vmem:[#allocation2 + $0xc8] sm:$0xff]   ;;  %v879_v9 = vld [vmem:[#allocation2 + $0x10] sm:$0xff]   ;;  %s695_s30 = sshll.u32 %s980_s29, 4  ;;  %s696_s30 = int_to_ptr.vmem [resolvable:$true] %s695_s30 }
  0x16   :  { %v873_v3 = vld [vmem:[#allocation2 + $0x80] sm:$0xff]   ;;  %790 = vmatprep.subr.bf16.mxu1 %v872_v2  ;;  %770 = vmatprep.subr.bf16.mxu0 %v874_v4  ;;  %v877_v7 = vld [vmem:[#allocation2 + $0x88] sm:$0xff]   ;;  %v880_v10 = vld [vmem:[#allocation2 + $0xd0] sm:$0xff]   ;;  %s948_s6 = scalar_lea.vmem %s696_s30, 64  ;;  %p953_p9 = scmp.lt.s32.totalorder %s696_s30, %s696_s30 }
  0x17   :  { %791 = vmatpush3.bf16.msra.mxu1 %v873_v3  ;;  %v881_v11 = vld [vmem:[#allocation2 + $0x90] sm:$0xff]   ;;  %v882_v12 = vld [vmem:[#allocation2 + $0x58] sm:$0xff]   ;;  %v886_v16 = vld [vmem:[#allocation2 + $0x60] sm:$0xff]   ;;  %p949_p8 = scmp.ne.s32.totalorder %s696_s30, %s948_s6  ;;  %p954_p10 = scmp.lt.s32.totalorder %s948_s6, %s948_s6 }
  0x18   :  { %792 = vmatprep.subr.bf16.mxu1 %v876_v6  ;;  %v883_v13 = vld [vmem:[#allocation2 + $0x18] sm:$0xff]   ;;  %v887_v17 = vld [vmem:[#allocation2 + $0x20] sm:$0xff]   ;;  %v890_v20 = vld [vmem:[#allocation2 + $0x68] sm:$0xff]  }
  0x19   :  { %771 = vmatpush3.bf16.msra.mxu0 %v875_v5  ;;  %v884_v14 = vld [vmem:[#allocation2 + $0xd8] sm:$0xff]   ;;  %v888_v18 = vld [vmem:[#allocation2 + $0xe0] sm:$0xff]   ;;  %v891_v21 = vld [vmem:[#allocation2 + $0x28] sm:$0xff]   ;;  %p955_p11 = por %p954_p10, %p953_p9 }
  0x1a   :  { %772 = vmatprep.subr.bf16.mxu0 %v878_v8  ;;  %v885_v15 = vld [vmem:[#allocation2 + $0x98] sm:$0xff]   ;;  %v889_v19 = vld [vmem:[#allocation2 + $0xa0] sm:$0xff]   ;;  %v892_v22 = vld [vmem:[#allocation2 + $0xe8] sm:$0xff]  }
  0x1b   :  { %793 = vmatpush3.bf16.msra.mxu1 %v877_v7  ;;  %v893_v23 = vld [vmem:[#allocation2 + $0xa8] sm:$0xff]   ;;  %v894_v24 = vld [vmem:[#allocation2 + $0x70] sm:$0xff]   ;;  %v898_v28 = vld [vmem:[#allocation2 + $0x78] sm:$0xff]   ;;  %p956_p12 = pnand %p955_p11, %p949_p8 }
  0x1c   :  { %794 = vmatprep.subr.bf16.mxu1 %v880_v10  ;;  %v895_v25 = vld [vmem:[#allocation2 + $0x30] sm:$0xff]   ;;  %v899_v29 = vld [vmem:[#allocation2 + $0x38] sm:$0xff]   ;;  %v36_v31 = vld [vmem:[%s1074_s0] sm:$0xff] }
  0x1d   :  { %773 = vmatpush3.bf16.msra.mxu0 %v879_v9  ;;  %v896_v26 = vld [vmem:[#allocation2 + $0xf0] sm:$0xff]   ;;  %v900_v30 = vld [vmem:[#allocation2 + $0xf8] sm:$0xff]   ;;  %v39_v33 = vmax.bf16 %v977_v32, %v36_v31  ;;  %v902_v35 = vld [vmem:[#allocation2 + $0x140] sm:$0xff]  }
  0x1e   :  { %774 = vmatprep.subr.bf16.mxu0 %v882_v12  ;;  %v897_v27 = vld [vmem:[#allocation2 + $0xb0] sm:$0xff]   ;;  %v901_v34 = vld [vmem:[#allocation2 + $0xb8] sm:$0xff]   ;;  %v903_v40 = vld [vmem:[#allocation2 + $0x100] sm:$0xff]  }
  0x1f   :  { %795 = vmatpush3.bf16.msra.mxu1 %v881_v11  ;;  %v37_v36 = vld [vmem:[%s1074_s0 + $0x8] sm:$0xff]  ;;  %v706_v37 = vcombine.high %v39_v33, %v39_v33  ;;  %v705_v38 = vcombine.low %v39_v33, %v39_v33  ;;  %v904_v41 = vld [vmem:[#allocation2 + $0x148] sm:$0xff]   ;;  %v908_v47 = vld [vmem:[#allocation2 + $0x158] sm:$0xff]  }
  0x20   :  { %796 = vmatprep.subr.bf16.mxu1 %v884_v14  ;;  %v40_v39 = vmax.bf16 %v977_v32, %v37_v36  ;;  %v905_v44 = vld [vmem:[#allocation2 + $0x108] sm:$0xff]   ;;  %v906_v45 = vld [vmem:[#allocation2 + $0x150] sm:$0xff]   ;;  %v909_v48 = vld [vmem:[#allocation2 + $0x118] sm:$0xff]  }
  0x21   :  { %775 = vmatpush3.bf16.msra.mxu0 %v883_v13  ;;  %486 = vmatprep.mubr.bf16.mxu0 %v706_v37  ;;  %v907_v46 = vld [vmem:[#allocation2 + $0x110] sm:$0xff]   ;;  %v910_v49 = vld [vmem:[#allocation2 + $0x160] sm:$0xff]   ;;  %v38_v51 = vld [vmem:[%s1074_s0 + $0x10] sm:$0xff] }
  0x22   :  { %776 = vmatprep.subr.bf16.mxu0 %v886_v16  ;;  %v708_v42 = vcombine.high %v40_v39, %v40_v39  ;;  %v707_v43 = vcombine.low %v40_v39, %v40_v39  ;;  %v911_v50 = vld [vmem:[#allocation2 + $0x120] sm:$0xff]   ;;  %v912_v52 = vld [vmem:[#allocation2 + $0x168] sm:$0xff]   ;;  %v41_v53 = vmax.bf16 %v977_v32, %v38_v51  ;;  %v914_v56 = vld [vmem:[#allocation2 + $0x170] sm:$0xff]  }
  0x23   :  { %797 = vmatpush3.bf16.msra.mxu1 %v885_v15  ;;  %v913_v55 = vld [vmem:[#allocation2 + $0x128] sm:$0xff]   ;;  %v915_v57 = vld [vmem:[#allocation2 + $0x130] sm:$0xff]   ;;  %v916_v58 = vld [vmem:[#allocation2 + $0x178] sm:$0xff]  }
  0x24   :  { %798 = vmatprep.subr.bf16.mxu1 %v888_v18  ;;  %526 = vmatprep.mubr.bf16.mxu1 %v708_v42  ;;  %v710_v54 = vcombine.high %v41_v53, %v41_v53  ;;  %v917_v59 = vld [vmem:[#allocation2 + $0x138] sm:$0xff]   ;;  %v709_v60 = vcombine.low %v41_v53, %v41_v53  ;;  %v918_v61 = vld [vmem:[%s1077_s3] sm:$0xff]   ;;  %v919_v63 = vld [vmem:[%s1077_s3 + $0x8] sm:$0xff]  }
  0x25   :  { %777 = vmatpush3.bf16.msra.mxu0 %v887_v17  ;;  %v920_v0 = vld [vmem:[%s1077_s3 + $0x10] sm:$0xff]   ;;  %v921_v1 = vld [vmem:[%s1077_s3 + $0x18] sm:$0xff]   ;;  %v922_v2 = vld [vmem:[%s1077_s3 + $0x20] sm:$0xff]  }
  0x26   :  { %778 = vmatprep.subr.bf16.mxu0 %v890_v20  ;;  %v923_v3 = vld [vmem:[%s1077_s3 + $0x28] sm:$0xff]   ;;  %v924_v4 = vld [vmem:[%s1077_s3 + $0x30] sm:$0xff]   ;;  %v925_v5 = vld [vmem:[%s1077_s3 + $0x38] sm:$0xff]  }
  0x27   :  { %799 = vmatpush3.bf16.msra.mxu1 %v889_v19  ;;  %v704_v7 = vld [vmem:[%s1076_s2] ss:$0 sm:$0xff] }
  0x28   :  { %800 = vmatprep.subr.bf16.mxu1 %v892_v22 }
  0x29   :  { %779 = vmatpush3.bf16.msra.mxu0 %v891_v21 }
  0x2a   :  { %780 = vmatprep.subr.bf16.mxu0 %v894_v24 }
  0x2b   :  { %801 = vmatpush3.bf16.msra.mxu1 %v893_v23 }
  0x2c   :  { %802 = vmatprep.subr.bf16.mxu1 %v896_v26 }
  0x2d   :  { %781 = vmatpush3.bf16.msra.mxu0 %v895_v25 }
  0x2e   :  { %782 = vmatprep.subr.bf16.mxu0 %v898_v28 }
  0x2f   :  { %803 = vmatpush3.bf16.msra.mxu1 %v897_v27  ;;  %v759_v27 = vld [vmem:[%s1078_s4] ss:$0 sm:$0xff] }
  0x30   :  { %804 = vmatprep.subr.bf16.mxu1 %v900_v30 }
  0x31   :  { %783 = vmatpush3.bf16.msra.mxu0 %v899_v29 }
  0x32   :  { %812 = vmatprep.subr.bf16.mxu0 %v902_v35 }
  0x33   :  { %805 = vmatpush3.bf16.msra.mxu1 %v901_v34 }
  0x34   :  { %487 = vmatmul.mubr.bf16.vlgmr.msra.gmra.mrb[0].mxu0 %v705_v38  ;;  %843 = vmatprep.subr.bf16.mxu1 %v978_v62 }
  0x35   :  { %813 = vmatpush3.bf16.msra.mxu0 %v903_v40  ;;  %566 = vmatprep.mubr.bf16.mxu0 %v710_v54 }
  0x36   :  { %527 = vmatmul.mubr.bf16.vlgmr.msra.gmra.mrb[0].mxu1 %v707_v43  ;;  %814 = vmatprep.subr.bf16.mxu0 %v904_v41 }
  0x37   :  { %844 = vmatpush3.bf16.msra.mxu1 %v918_v61  ;;  %859 = vmatprep.mubr.msk.bf16.mxu1 %vm979_vm0, %v978_v62 }
  0x38   :  { %845 = vmatprep.subr.bf16.mxu1 %v978_v62 }
  0x39   :  { %815 = vmatpush3.bf16.msra.mxu0 %v905_v44 }
  0x3a   :  { %816 = vmatprep.subr.bf16.mxu0 %v906_v45 }
  0x3b   :  { %846 = vmatpush3.bf16.msra.mxu1 %v919_v63 }
  0x3c   :  { %847 = vmatprep.subr.bf16.mxu1 %v978_v62 }
  0x3d   :  { %817 = vmatpush3.bf16.msra.mxu0 %v907_v46 }
  0x3e   :  { %818 = vmatprep.subr.bf16.mxu0 %v908_v47 }
  0x3f   :  { %848 = vmatpush3.bf16.msra.mxu1 %v920_v0 }
  0x40   :  { %849 = vmatprep.subr.bf16.mxu1 %v978_v62 }
  0x41   :  { %819 = vmatpush3.bf16.msra.mxu0 %v909_v48 }
  0x42   :  { %820 = vmatprep.subr.bf16.mxu0 %v910_v49 }
  0x43   :  { %850 = vmatpush3.bf16.msra.mxu1 %v921_v1 }
  0x44   :  { %851 = vmatprep.subr.bf16.mxu1 %v978_v62 }
  0x45   :  { %821 = vmatpush3.bf16.msra.mxu0 %v911_v50 }
  0x46   :  { %822 = vmatprep.subr.bf16.mxu0 %v912_v52 }
  0x47   :  { %852 = vmatpush3.bf16.msra.mxu1 %v922_v2 }
  0x48   :  { %853 = vmatprep.subr.bf16.mxu1 %v978_v62 }
  0x49   :  { %823 = vmatpush3.bf16.msra.mxu0 %v913_v55 }
  0x4a   :  { %824 = vmatprep.subr.bf16.mxu0 %v914_v56 }
  0x4b   :  { %854 = vmatpush3.bf16.msra.mxu1 %v923_v3 }
  0x4c   :  { %855 = vmatprep.subr.bf16.mxu1 %v978_v62 }
  0x4d   :  { %825 = vmatpush3.bf16.msra.mxu0 %v915_v57 }
  0x4e   :  { %826 = vmatprep.subr.bf16.mxu0 %v916_v58 }
  0x4f   :  { %856 = vmatpush3.bf16.msra.mxu1 %v924_v4 }
  0x50   :  { %857 = vmatprep.subr.bf16.mxu1 %v978_v62 }
  0x51   :  { %827 = vmatpush3.bf16.msra.mxu0 %v917_v59 }
  0x53   :  { %858 = vmatpush3.bf16.msra.mxu1 %v925_v5 }
  0x54   :  { %567 = vmatmul.mubr.bf16.vlgmr.msra.gmra.mrb[4].mxu0 %v709_v60 }
 0x107   :  { %v784_v6 = vpop.f32.mrb[0].mxu0 }
 0x108   :  { %v785_v8 = vpop.f32.mrb[1].mxu0 }
 0x109   :  { %v786_v9 = vadd.f32 %v785_v8, %v784_v6  ;;  %v787_v10 = vpop.f32.mrb[2].mxu0  ;;  %v806_v11 = vpop.f32.mrb[0].mxu1 }
 0x10a   :  { %v788_v12 = vpop.f32.mrb[3].mxu0  ;;  %v807_v13 = vpop.f32.mrb[1].mxu1 }
 0x10b   :  { %v489_v14 = vadd.f32 %v786_v9, %v704_v7  ;;  %v808_v15 = vadd.f32 %v807_v13, %v806_v11  ;;  %v809_v16 = vpop.f32.mrb[2].mxu1 }
 0x10c   :  { %v810_v17 = vpop.f32.mrb[3].mxu1 }
 0x10d   :  { %v529_v18 = vadd.f32 %v808_v15, %v489_v14 }
 0x127   :  { %v828_v19 = vpop.f32.mrb[4].mxu0 }
 0x128   :  { %v829_v20 = vpop.f32.mrb[5].mxu0 }
 0x129   :  { %v830_v21 = vadd.f32 %v829_v20, %v828_v19  ;;  %v831_v22 = vpop.f32.mrb[6].mxu0 }
 0x12a   :  { %v832_v23 = vpop.f32.mrb[7].mxu0 }
 0x12b   :  { %v569_v24 = vadd.f32 %v830_v21, %v529_v18 }
 0x12d   :  { %v574_v25 = vmax.f32 %v569_v24, 0.0 }
 0x12f   :  { %v575_v26 = vpack.c.bf16 %v574_v25, %v574_v25 }
 0x131   :  { %860 = vmatmul.mubr.bf16.vlgmr.msra.gmra.mrb[4].mxu1 %v575_v26 }
 0x204   :  { %v681_v28 = vpop.f32.mrb[4].mxu1 }
 0x205   :  { %v682_v29 = vadd.f32 %v759_v27, %v681_v28  ;;  %v861_v30 = vpop.f32.mrb[5].mxu1 }
 0x206   :  { %v684_v31 = vpop.f32.mrb[6].mxu1 }
 0x207   :  { %v687_v32 = vpack.c.bf16 %v682_v29, %v682_v29  ;;  %v862_v33 = vpop.f32.mrb[7].mxu1 }
 0x209   :  { %688 = vst [vmem:[#allocation5] sm:$0xf] %v687_v32 }
 0x20a   :  { %959 = shalt.err (!%p956_p12)
}
 0x20b   :  { %s960_s4 = scalar_lea.hbm %s1079_s5, 64 }
 0x20c   :  { %p961_p13 = scmp.ne.s32.totalorder %s1079_s5, %s960_s4  ;;  %p964_p0 = scmp.lt.u32.totalorder %s960_s4, %s1079_s5 }
 0x20e   :  { %p966_p1 = pnand %p964_p0, %p961_p13 }
 0x210   :  { %969 = shalt.err (!%p966_p1)
}
 0x211   :  { %698 = dma.vmem_to_hbm [thread:$0]  %s696_s30, 64, %s1079_s5, [#allocation4]  }
 0x212   :  { %972 = dma.done.wait [#allocation4], 64  }
 0x213   :  { %973 = vsyncadd [#allocation4], 4294967232 }
 0x214   :  { %702 = vsyncpa [#allocation3], 1 }
 0x215   :  { %703 = vsyncpa [#allocation4], 1 }

</bundles_post_ra>
